<compile_context>
chip_gen: v7x
topology: tpu7x:2x2x1
jax: 0.10.0
libtpu: 0.0.40
codegen_flags: <defaults>
</compile_context>

<pallas_src>
import functools

import jax
import jax.numpy as jnp
from jax.experimental import pallas as pl
from jax.experimental.pallas import tpu as pltpu


def _layernorm_packed_kernel(seg_ref, x_ref, o_ref, *, eps, hidden):
    # seg_ref: (3*lane_w, lane_w) bf16 resident block-diagonal 0/1 matrix,
    #          stacked 3x along the contraction axis for the split-precision dots.
    #          seg[i, j] = (i//hidden == j//hidden)  ->  (v @ seg) gives each
    #          logical row's sum broadcast over its own lane segment.
    # x_ref:   (row_tile, lane_w); each vreg row holds lane_w//hidden logical rows.
    lane_w = x_ref.shape[-1]
    x = x_ref[...]
    xf = x.astype(jnp.float32)
    seg3 = seg_ref[...]

    # ---- per-row sum of x -> mean (broadcast across each lane segment) ----
    if x.dtype == jnp.bfloat16:
        # bf16 input is exactly representable: a single K=lane_w MXU pass.
        s = jnp.dot(x, seg3[:lane_w, :], preferred_element_type=jnp.float32)
    else:
        # 3-way bf16 split (~2^-26 relative) fused into one K=3*lane_w dot, so a
        # large DC offset in x does not pollute (x - mean) relative to std.
        h1 = xf.astype(jnp.bfloat16)
        r1 = xf - h1.astype(jnp.float32)
        h2 = r1.astype(jnp.bfloat16)
        h3 = (r1 - h2.astype(jnp.float32)).astype(jnp.bfloat16)
        s = jnp.dot(jnp.concatenate([h1, h2, h3], axis=-1), seg3,
                    preferred_element_type=jnp.float32)

    mean = s * (1.0 / hidden)
    d = xf - mean                                  # centered -> no cancellation below

    # ---- two-pass (torch-style) unbiased variance on the centered values ----
    dd = d * d
    hi = dd.astype(jnp.bfloat16)
    lo = (dd - hi.astype(jnp.float32)).astype(jnp.bfloat16)
    ssq = jnp.dot(jnp.concatenate([hi, lo], axis=-1), seg3[:2 * lane_w, :],
                  preferred_element_type=jnp.float32)

    # TODO(synk): hidden == 1 makes N-1 == 0; torch returns NaN there and so do we.
    inv_nm1 = 1.0 / (hidden - 1) if hidden > 1 else float("nan")
    std = jnp.sqrt(jnp.maximum(ssq * inv_nm1, 0.0))   # clamp split-rounding dust
    inv = pl.reciprocal(std + eps, approx=False)      # EUP reciprocal, exact
    o_ref[...] = (d * inv).astype(o_ref.dtype)


def _layernorm_kernel(x_ref, o_ref, *, eps, hidden):
    # Unpacked path (hidden >= 128): plain cross-lane (XLU) reductions, two-pass.
    # TODO(synk): on v7x the two XLU reduces + (R,1) broadcasts may become the
    # binding slot; an MXU ones-matrix reduction (as in the packed path) is a
    # possible follow-up if profiling shows XLU-bound behaviour.
    xf = x_ref[...].astype(jnp.float32)
    mean = jnp.sum(xf, axis=-1, keepdims=True) * (1.0 / hidden)
    d = xf - mean
    inv_nm1 = 1.0 / (hidden - 1) if hidden > 1 else float("nan")
    var = jnp.sum(d * d, axis=-1, keepdims=True) * inv_nm1
    std = jnp.sqrt(var)
    inv = pl.reciprocal(std + eps, approx=False)
    o_ref[...] = (d * inv).astype(o_ref.dtype)


def layer_norm(x, eps=1e-6, *, max_block_bytes=None):
    """LayerNorm over the last axis (no affine params), matching the torch module.

    max_block_bytes: optional override of the per-block input byte budget
    (used in tests to exercise the multi-block / partial-block path on small data).
    """
    orig_shape = x.shape
    hidden = int(orig_shape[-1])
    rows = 1
    for dim in orig_shape[:-1]:
        rows *= int(dim)
    if rows == 0 or hidden == 0:
        return x

    dtype = jnp.dtype(x.dtype)
    dtype_bytes = dtype.itemsize

    # ---- lane packing for small hidden (free, row-major reinterpretation) ----
    # TODO(synk): when rows is not divisible by any pack factor we fall back to
    # lane_w == hidden (masked partial stores); a packed main body plus a small
    # unpacked tail call would keep the bulk lane-dense.
    pack = 1
    if hidden < 128 and 128 % hidden == 0:
        p = 128 // hidden
        while p > 1 and rows % p != 0:
            p //= 2
        pack = p
    lane_w = hidden * pack
    prows = rows // pack
    x2 = x.reshape(prows, lane_w)          # contiguous -> metadata-only reshape

    # ---- fixed ~1 MiB input blocks; keep >= MIN_BLOCKS grid steps if possible ----
    sub = {1: 32, 2: 16}.get(dtype_bytes, 8)        # native sublane tile height
    target_bytes = 1 * 1024 * 1024 if max_block_bytes is None else int(max_block_bytes)
    row_tile = max(1, target_bytes // (lane_w * dtype_bytes))
    MIN_BLOCKS = 4                                   # pipeline depth + both v7x TCs
    cap = -(-prows // MIN_BLOCKS)
    cap = ((cap + sub - 1) // sub) * sub
    row_tile = min(row_tile, cap)
    row_tile = max(sub, (row_tile // sub) * sub)
    if row_tile >= prows:
        row_tile = prows                             # tiny input: single full block
    num_blocks = pl.cdiv(prows, row_tile)            # partial last block is masked

    mxu_flops = (10 * prows * lane_w * lane_w) if pack > 1 else 0
    cost = pl.CostEstimate(
        flops=7 * rows * hidden + mxu_flops,
        transcendentals=2 * rows,                    # one sqrt + one reciprocal / row
        bytes_accessed=2 * rows * hidden * dtype_bytes,
    )
    cparams = pltpu.CompilerParams(
        dimension_semantics=("parallel",),           # independent row blocks
        vmem_limit_bytes=48 * 1024 * 1024,           # modest: blocks are ~1 MiB
    )

    if pack > 1:
        # Hoisted reduction matrix: built once, resident across grid steps.
        seg = jnp.kron(jnp.eye(pack, dtype=jnp.float32),
                       jnp.ones((hidden, hidden), dtype=jnp.float32))
        seg3 = jnp.tile(seg, (3, 1)).astype(jnp.bfloat16)   # (3*lane_w, lane_w)
        kernel = functools.partial(_layernorm_packed_kernel,
                                   eps=float(eps), hidden=hidden)
        out2 = pl.pallas_call(
            kernel,
            out_shape=jax.ShapeDtypeStruct((prows, lane_w), x.dtype),
            grid_spec=pltpu.PrefetchScalarGridSpec(
                num_scalar_prefetch=0,
                grid=(num_blocks,),
                in_specs=[pl.BlockSpec((3 * lane_w, lane_w), lambda i: (0, 0)),
                          pl.BlockSpec((row_tile, lane_w), lambda i: (i, 0))],
                out_specs=pl.BlockSpec((row_tile, lane_w), lambda i: (i, 0)),
            ),
            compiler_params=cparams,
            cost_estimate=cost,
        )(seg3, x2)
    else:
        kernel = functools.partial(_layernorm_kernel,
                                   eps=float(eps), hidden=hidden)
        out2 = pl.pallas_call(
            kernel,
            out_shape=jax.ShapeDtypeStruct((prows, lane_w), x.dtype),
            grid_spec=pltpu.PrefetchScalarGridSpec(
                num_scalar_prefetch=0,
                grid=(num_blocks,),
                in_specs=[pl.BlockSpec((row_tile, lane_w), lambda i: (i, 0))],
                out_specs=pl.BlockSpec((row_tile, lane_w), lambda i: (i, 0)),
            ),
            compiler_params=cparams,
            cost_estimate=cost,
        )(x2)

    return out2.reshape(orig_shape)


def _reference(x, eps=1e-6):
    # Pure-JAX reference mirroring torch semantics (unbiased std, eps on std).
    x = x.astype(jnp.float32)
    mean = jnp.mean(x, axis=-1, keepdims=True)
    var = jnp.sum((x - mean) ** 2, axis=-1, keepdims=True) / (x.shape[-1] - 1)
    std = jnp.sqrt(var)
    return (x - mean) / (std + eps)


if __name__ == "__main__":
    root = jax.random.PRNGKey(0)

    # (shape, dtype, layer_norm kwargs, dc_offset, atol, rtol)
    cases = [
        # lane-packed path (hidden=32 -> 4 rows per 128-lane vreg row), single block
        ((2, 16, 32), jnp.float32, {}, 0.0, 1e-4, 1e-4),
        # hidden >= 128 path (XLU reductions), multi-block grid
        ((4, 8, 128), jnp.float32, {}, 0.0, 2e-5, 2e-5),
        # lane-packed, multi-block grid with a partial (masked) last block
        ((7, 100, 32), jnp.float32, {"max_block_bytes": 16 * 1024}, 0.0, 1e-4, 1e-4),
        # unpacked, hidden not a multiple of 128, partial last block
        ((3, 40, 160), jnp.float32, {"max_block_bytes": 20 * 1024}, 0.0, 2e-5, 2e-5),
        # bf16 I/O (f32 compute inside the kernel; exact bf16 mean path)
        ((2, 16, 32), jnp.bfloat16, {}, 0.0, 2e-2, 2e-2),
        # non-zero-mean input: exercises two-pass variance + 3-way-split mean
        ((4, 64, 32), jnp.float32, {}, 10.0, 2e-4, 2e-4),
    ]

    for idx, (shape, dtype, kwargs, offset, atol, rtol) in enumerate(cases):
        k = jax.random.fold_in(root, idx)
        x = (jax.random.normal(k, shape, dtype=jnp.float32) + offset).astype(dtype)
        out = jax.block_until_ready(layer_norm(x, eps=1e-6, **kwargs))
        assert out.shape == x.shape and out.dtype == x.dtype
        ref = _reference(x.astype(jnp.float32), eps=1e-6)
        ok = jnp.allclose(out.astype(jnp.float32), ref, atol=atol, rtol=rtol)
        assert bool(ok), f"mismatch for case {idx}: shape={shape} dtype={dtype}"

    print("KERNEL_OK")
</pallas_src>

<mosaic_0001>
module attributes {stable_mosaic.version = 11 : i64} {
  func.func @_layernorm_packed_kernel(%arg0: i32, %arg1: memref<384x128xbf16, #tpu.memory_space<vmem>>, %arg2: memref<8x128xf32, #tpu.memory_space<vmem>>, %arg3: memref<8x128xf32, #tpu.memory_space<vmem>>) attributes {dimension_semantics = [#tpu.dimension_semantics<parallel>], iteration_bounds = array<i64: 1>, scalar_prefetch = 0 : i64, scratch_operands = 0 : i64, tpu.core_type = #tpu.core_type<tc>, window_params = [{pipeline_mode = #tpu.pipeline_mode<synchronous>, transform_indices = @transform_0, window_bounds = array<i64: 384, 128>}, {transform_indices = @transform_1, window_bounds = array<i64: 8, 128>}, {transform_indices = @transform_2, window_bounds = array<i64: 8, 128>}]} {
    %c0 = arith.constant 0 : index
    %c0_0 = arith.constant 0 : index
    %0 = vector.load %arg2[%c0, %c0_0] : memref<8x128xf32, #tpu.memory_space<vmem>>, vector<8x128xf32>
    %c0_1 = arith.constant 0 : index
    %c0_2 = arith.constant 0 : index
    %1 = vector.load %arg1[%c0_1, %c0_2] : memref<384x128xbf16, #tpu.memory_space<vmem>>, vector<384x128xbf16>
    %2 = arith.truncf %0 : vector<8x128xf32> to vector<8x128xbf16>
    %3 = arith.extf %2 : vector<8x128xbf16> to vector<8x128xf32>
    %4 = arith.subf %0, %3 : vector<8x128xf32>
    %5 = arith.truncf %4 : vector<8x128xf32> to vector<8x128xbf16>
    %6 = arith.extf %5 : vector<8x128xbf16> to vector<8x128xf32>
    %7 = arith.subf %4, %6 : vector<8x128xf32>
    %8 = arith.truncf %7 : vector<8x128xf32> to vector<8x128xbf16>
    %9 = tpu.concatenate %2, %5, %8 in 1 : vector<8x128xbf16>, vector<8x128xbf16>, vector<8x128xbf16> -> vector<8x384xbf16>
    %cst = arith.constant dense<0.000000e+00> : vector<8x128xf32>
    %10 = tpu.matmul %9, %1, %cst {dimension_numbers = #tpu.dot_dimension_numbers<[1], [0], [0], [1], [0, 0, 1, 1], [], []>} : vector<8x384xbf16>, vector<384x128xbf16>, vector<8x128xf32> -> vector<8x128xf32>
    %cst_3 = arith.constant 3.125000e-02 : f32
    %11 = vector.broadcast %cst_3 : f32 to vector<8x128xf32>
    %12 = arith.mulf %10, %11 : vector<8x128xf32>
    %13 = arith.subf %0, %12 : vector<8x128xf32>
    %14 = arith.mulf %13, %13 : vector<8x128xf32>
    %15 = arith.truncf %14 : vector<8x128xf32> to vector<8x128xbf16>
    %16 = arith.extf %15 : vector<8x128xbf16> to vector<8x128xf32>
    %17 = arith.subf %14, %16 : vector<8x128xf32>
    %18 = arith.truncf %17 : vector<8x128xf32> to vector<8x128xbf16>
    %19 = tpu.concatenate %15, %18 in 1 : vector<8x128xbf16>, vector<8x128xbf16> -> vector<8x256xbf16>
    %20 = vector.extract_strided_slice %1 {offsets = [0, 0], sizes = [256, 128], strides = [1, 1]} : vector<384x128xbf16> to vector<256x128xbf16>
    %cst_4 = arith.constant dense<0.000000e+00> : vector<8x128xf32>
    %21 = tpu.matmul %19, %20, %cst_4 {dimension_numbers = #tpu.dot_dimension_numbers<[1], [0], [0], [1], [0, 0, 1, 1], [], []>} : vector<8x256xbf16>, vector<256x128xbf16>, vector<8x128xf32> -> vector<8x128xf32>
    %cst_5 = arith.constant 0.0322580636 : f32
    %22 = vector.broadcast %cst_5 : f32 to vector<8x128xf32>
    %23 = arith.mulf %21, %22 : vector<8x128xf32>
    %cst_6 = arith.constant 0.000000e+00 : f32
    %24 = vector.broadcast %cst_6 : f32 to vector<8x128xf32>
    %25 = arith.maximumf %23, %24 : vector<8x128xf32>
    %26 = math.sqrt %25 : vector<8x128xf32>
    %cst_7 = arith.constant 9.99999997E-7 : f32
    %27 = vector.broadcast %cst_7 : f32 to vector<8x128xf32>
    %28 = arith.addf %26, %27 : vector<8x128xf32>
    %29 = tpu.reciprocal %28 : vector<8x128xf32> -> vector<8x128xf32>
    %30 = arith.mulf %13, %29 : vector<8x128xf32>
    %c0_8 = arith.constant 0 : index
    %c0_9 = arith.constant 0 : index
    %31 = vector.load %arg3[%c0_8, %c0_9] : memref<8x128xf32, #tpu.memory_space<vmem>>, vector<8x128xf32>
    tpu.vector_store %arg3[%c0_8, %c0_9], %30 {strides = array<i32>} : memref<8x128xf32, #tpu.memory_space<vmem>>, vector<8x128xf32>,
    return
  }
  func.func @transform_0(%arg0: i32) -> (i32, i32) {
    %c0_i32 = arith.constant 0 : i32
    %c0_i32_0 = arith.constant 0 : i32
    %c0_i32_1 = arith.constant 0 : i32
    return %c0_i32, %c0_i32_0 : i32, i32
  }
  func.func @transform_1(%arg0: i32) -> (i32, i32) {
    %c0_i32 = arith.constant 0 : i32
    %c0_i32_0 = arith.constant 0 : i32
    return %arg0, %c0_i32 : i32, i32
  }
  func.func @transform_2(%arg0: i32) -> (i32, i32) {
    %c0_i32 = arith.constant 0 : i32
    %c0_i32_0 = arith.constant 0 : i32
    return %arg0, %c0_i32 : i32, i32
  }
}

</mosaic_0001>

<bundles_post_ra>
// kernel: tpu_custom_call.1
= control target key start
LH: loop header
LB: loop body
LE: loop exit
PB: predicated region body
PF: predicated region fallthrough
CT: control target
= control target key end

     0   :  { %7 = vsyncpa [#allocation3], 0  ;;  %s661_s0 = inlined_call_operand.hbm [shape: bf16[384,128], index: 0, kind: input, shape index: {}]   ;;  %s662_s1 = inlined_call_operand.hbm [shape: f32[8,128], index: 1, kind: input, shape index: {}]   ;;  %s663_s2 = inlined_call_operand.hbm [shape: f32[8,128], index: 2, kind: output, shape index: {}]  }
   0x1   :  { %8 = vsyncpa [#allocation6], 0 }
   0x2   :  { %9 = vsyncpa [#allocation4], 0  ;;  %s599_s9 = smov [#allocation2]   ;;  %s527_s13 = scalar_lea.hbm %s661_s0, 3072 }
   0x3   :  { %s15_s10 = sshll.u32 %s599_s9, 4  ;;  %p528_p0 = scmp.ne.s32.totalorder %s661_s0, %s527_s13  ;;  %s16_s10 = int_to_ptr.vmem [resolvable:$true] %s15_s10 }
   0x4   :  { %p531_p1 = scmp.lt.u32.totalorder %s527_s13, %s661_s0 }
   0x6   :  { %p533_p2 = pnand %p531_p1, %p528_p0 }
   0x8   :  { %536 = shalt.err (!%p533_p2)
}
   0x9   :  { %s537_s18 = scalar_lea.vmem %s16_s10, 3072  ;;  %p542_p4 = scmp.lt.s32.totalorder %s16_s10, %s16_s10 }
   0xa   :  { %p538_p3 = scmp.ne.s32.totalorder %s16_s10, %s537_s18  ;;  %p543_p5 = scmp.lt.s32.totalorder %s537_s18, %s537_s18 }
   0xc   :  { %p544_p6 = por %p543_p5, %p542_p4 }
   0xe   :  { %p545_p7 = pnand %p544_p6, %p538_p3 }
  0x10   :  { %548 = shalt.err (!%p545_p7)
}
  0x11   :  { %s600_s19 = smov 64   ;;  %s601_s20 = smov 4  }
  0x12   :  { %21 = dma.hbm_to_vmem [thread:$0]  %s661_s0, 3072, %s16_s10, [#allocation3], %s600_s19, %s600_s19, %s601_s20  }
  0x13   :  { %s602_s23 = smov [#allocation5]   ;;  %s549_s27 = scalar_lea.hbm %s662_s1, 128 }
  0x14   :  { %s28_s24 = sshll.u32 %s602_s23, 4  ;;  %p550_p8 = scmp.ne.s32.totalorder %s662_s1, %s549_s27  ;;  %s29_s24 = int_to_ptr.vmem [resolvable:$true] %s28_s24 }
  0x15   :  { %p553_p9 = scmp.lt.u32.totalorder %s549_s27, %s662_s1 }
  0x17   :  { %p555_p10 = pnand %p553_p9, %p550_p8 }
  0x19   :  { %558 = shalt.err (!%p555_p10)
}
  0x1a   :  { %s559_s4 = scalar_lea.vmem %s29_s24, 128  ;;  %p564_p12 = scmp.lt.s32.totalorder %s29_s24, %s29_s24 }
  0x1b   :  { %p560_p11 = scmp.ne.s32.totalorder %s29_s24, %s559_s4  ;;  %p565_p13 = scmp.lt.s32.totalorder %s559_s4, %s559_s4 }
  0x1d   :  { %p566_p0 = por %p565_p13, %p564_p12 }
  0x1f   :  { %p567_p1 = pnand %p566_p0, %p560_p11 }
  0x21   :  { %570 = shalt.err (!%p567_p1)
}
  0x22   :  { %31 = dma.hbm_to_vmem [thread:$0]  %s662_s1, 128, %s29_s24, [#allocation6]  }
  0x23   :  { %593 = dma.done.wait [#allocation3], 3072  }
  0x24   :  { %594 = vsyncadd [#allocation3], 4294964224 }
  0x25   :  { %595 = dma.done.wait [#allocation6], 128  }
  0x26   :  { %596 = vsyncadd [#allocation6], 4294967168  ;;  %v603_v0 = vmov 0.0   ;;  %vm604_vm0 = vmmov 0   ;;  %v499_v1 = vld [vmem:[#allocation2 + $0x40] sm:$0xff]   ;;  %v502_v4 = vld [vmem:[#allocation2 + $0x48] sm:$0xff]  }
  0x27   :  { %472 = vmatprep.subr.bf16.mxu1 %v603_v0  ;;  %488 = vmatprep.mubr.msk.bf16.mxu1 %vm604_vm0, %v603_v0  ;;  %v645_v2 = vld [vmem:[#allocation2] sm:$0xff]   ;;  %v503_v5 = vld [vmem:[#allocation2 + $0x8] sm:$0xff]   ;;  %v505_v7 = vld [vmem:[#allocation2 + $0x50] sm:$0xff]   ;;  %s605_s1 = smov [#allocation7]  }
  0x28   :  { %419 = vmatprep.subr.bf16.mxu0 %v499_v1  ;;  %v501_v3 = vld [vmem:[#allocation2 + $0x80] sm:$0xff]   ;;  %v504_v6 = vld [vmem:[#allocation2 + $0x88] sm:$0xff]   ;;  %v506_v8 = vld [vmem:[#allocation2 + $0x10] sm:$0xff]   ;;  %s385_s6 = sshll.u32 %s605_s1, 4  ;;  %s386_s6 = int_to_ptr.vmem [resolvable:$true] %s385_s6 }
  0x29   :  { %420 = vmatpush3.bf16.msra.mxu0 %v645_v2  ;;  %473 = vmatpush3.bf16.msra.mxu1 %v501_v3  ;;  %v507_v9 = vld [vmem:[#allocation2 + $0x90] sm:$0xff]   ;;  %v508_v10 = vld [vmem:[#allocation2 + $0x58] sm:$0xff]   ;;  %v511_v13 = vld [vmem:[#allocation2 + $0x60] sm:$0xff]   ;;  %s571_s7 = scalar_lea.vmem %s386_s6, 128  ;;  %p576_p3 = scmp.lt.s32.totalorder %s386_s6, %s386_s6 }
  0x2a   :  { %421 = vmatprep.subr.bf16.mxu0 %v502_v4  ;;  %474 = vmatprep.subr.bf16.mxu1 %v603_v0  ;;  %v509_v11 = vld [vmem:[#allocation2 + $0x18] sm:$0xff]   ;;  %v512_v14 = vld [vmem:[#allocation2 + $0x20] sm:$0xff]   ;;  %v514_v16 = vld [vmem:[#allocation2 + $0x68] sm:$0xff]   ;;  %p572_p2 = scmp.ne.s32.totalorder %s386_s6, %s571_s7  ;;  %p577_p4 = scmp.lt.s32.totalorder %s571_s7, %s571_s7 }
  0x2b   :  { %v510_v12 = vld [vmem:[#allocation2 + $0x98] sm:$0xff]   ;;  %v513_v15 = vld [vmem:[#allocation2 + $0xa0] sm:$0xff]   ;;  %v515_v17 = vld [vmem:[#allocation2 + $0x28] sm:$0xff]  }
  0x2c   :  { %v516_v18 = vld [vmem:[#allocation2 + $0xa8] sm:$0xff]   ;;  %v517_v19 = vld [vmem:[#allocation2 + $0x70] sm:$0xff]   ;;  %v520_v22 = vld [vmem:[#allocation2 + $0x78] sm:$0xff]   ;;  %p578_p5 = por %p577_p4, %p576_p3 }
  0x2d   :  { %422 = vmatpush3.bf16.msra.mxu0 %v503_v5  ;;  %475 = vmatpush3.bf16.msra.mxu1 %v504_v6  ;;  %v518_v20 = vld [vmem:[#allocation2 + $0x30] sm:$0xff]   ;;  %v39_v23 = vld [vmem:[#allocation5] sm:$0xff]  ;;  %v521_v25 = vld [vmem:[#allocation2 + $0x38] sm:$0xff]  }
  0x2e   :  { %423 = vmatprep.subr.bf16.mxu0 %v505_v7  ;;  %476 = vmatprep.subr.bf16.mxu1 %v603_v0  ;;  %v519_v21 = vld [vmem:[#allocation2 + $0xb0] sm:$0xff]   ;;  %v88_v24 = vpack.c.bf16 %v39_v23, %v39_v23  ;;  %v522_v27 = vld [vmem:[#allocation2 + $0xb8] sm:$0xff]   ;;  %p579_p6 = pnand %p578_p5, %p572_p2 }
  0x30   :  { %v89_v26 = vunpack.c.l.bf16 %v88_v24 }
  0x31   :  { %424 = vmatpush3.bf16.msra.mxu0 %v506_v8  ;;  %477 = vmatpush3.bf16.msra.mxu1 %v507_v9 }
  0x32   :  { %425 = vmatprep.subr.bf16.mxu0 %v508_v10  ;;  %478 = vmatprep.subr.bf16.mxu1 %v603_v0  ;;  %v90_v28 = vsub.f32 %v39_v23, %v89_v26 }
  0x34   :  { %v91_v29 = vpack.c.bf16 %v90_v28, %v90_v28 }
  0x35   :  { %426 = vmatpush3.bf16.msra.mxu0 %v509_v11  ;;  %479 = vmatpush3.bf16.msra.mxu1 %v510_v12 }
  0x36   :  { %427 = vmatprep.subr.bf16.mxu0 %v511_v13  ;;  %480 = vmatprep.subr.bf16.mxu1 %v603_v0  ;;  %v92_v30 = vunpack.c.l.bf16 %v91_v29 }
  0x37   :  { %271 = vmatprep.mubr.bf16.mxu0 %v91_v29 }
  0x38   :  { %v93_v31 = vsub.f32 %v90_v28, %v92_v30 }
  0x39   :  { %428 = vmatpush3.bf16.msra.mxu0 %v512_v14  ;;  %481 = vmatpush3.bf16.msra.mxu1 %v513_v15 }
  0x3a   :  { %429 = vmatprep.subr.bf16.mxu0 %v514_v16  ;;  %482 = vmatprep.subr.bf16.mxu1 %v603_v0  ;;  %v94_v32 = vpack.c.bf16 %v93_v31, %v93_v31 }
  0x3d   :  { %430 = vmatpush3.bf16.msra.mxu0 %v515_v17  ;;  %483 = vmatpush3.bf16.msra.mxu1 %v516_v18 }
  0x3e   :  { %431 = vmatprep.subr.bf16.mxu0 %v517_v19  ;;  %484 = vmatprep.subr.bf16.mxu1 %v603_v0 }
  0x41   :  { %432 = vmatpush3.bf16.msra.mxu0 %v518_v20  ;;  %485 = vmatpush3.bf16.msra.mxu1 %v519_v21 }
  0x42   :  { %433 = vmatprep.subr.bf16.mxu0 %v520_v22  ;;  %486 = vmatprep.subr.bf16.mxu1 %v603_v0 }
  0x45   :  { %434 = vmatpush3.bf16.msra.mxu0 %v521_v25  ;;  %487 = vmatpush3.bf16.msra.mxu1 %v522_v27 }
  0x46   :  { %450 = vmatprep.subr.bf16.mxu0 %v499_v1 }
  0x48   :  { %272 = vmatmul.mubr.bf16.vlgmr.msra.gmra.mrb[0].mxu0 %v88_v24  ;;  %489 = vmatmul.mubr.bf16.vlgmr.msra.gmra.mrb[0].mxu1 %v94_v32 }
  0x49   :  { %451 = vmatpush3.bf16.msra.mxu0 %v645_v2 }
  0x4a   :  { %452 = vmatprep.subr.bf16.mxu0 %v502_v4 }
  0x4d   :  { %453 = vmatpush3.bf16.msra.mxu0 %v503_v5 }
  0x4e   :  { %454 = vmatprep.subr.bf16.mxu0 %v505_v7 }
  0x51   :  { %455 = vmatpush3.bf16.msra.mxu0 %v506_v8 }
  0x52   :  { %456 = vmatprep.subr.bf16.mxu0 %v508_v10 }
  0x55   :  { %457 = vmatpush3.bf16.msra.mxu0 %v509_v11 }
  0x56   :  { %458 = vmatprep.subr.bf16.mxu0 %v511_v13 }
  0x59   :  { %459 = vmatpush3.bf16.msra.mxu0 %v512_v14 }
  0x5a   :  { %460 = vmatprep.subr.bf16.mxu0 %v514_v16 }
  0x5d   :  { %461 = vmatpush3.bf16.msra.mxu0 %v515_v17 }
  0x5e   :  { %462 = vmatprep.subr.bf16.mxu0 %v517_v19 }
  0x61   :  { %463 = vmatpush3.bf16.msra.mxu0 %v518_v20 }
  0x62   :  { %464 = vmatprep.subr.bf16.mxu0 %v520_v22 }
  0x65   :  { %465 = vmatpush3.bf16.msra.mxu0 %v521_v25 }
 0x11b   :  { %v435_v33 = vpop.f32.mrb[0].mxu0  ;;  %v313_v38 = vpop.f32.mrb[0].mxu1 }
 0x11c   :  { %v436_v34 = vpop.f32.mrb[1].mxu0  ;;  %v490_v40 = vpop.f32.mrb[1].mxu1 }
 0x11d   :  { %v437_v35 = vadd.f32 %v436_v34, %v435_v33  ;;  %v438_v36 = vpop.f32.mrb[2].mxu0  ;;  %v316_v41 = vpop.f32.mrb[2].mxu1 }
 0x11e   :  { %v439_v37 = vpop.f32.mrb[3].mxu0  ;;  %v491_v43 = vpop.f32.mrb[3].mxu1 }
 0x11f   :  { %v314_v39 = vadd.f32 %v437_v35, %v313_v38 }
 0x121   :  { %v319_v42 = vmul.f32 0.03125, %v314_v39 }
 0x123   :  { %v320_v44 = vsub.f32 %v39_v23, %v319_v42 }
 0x125   :  { %v321_v45 = vmul.f32 %v320_v44, %v320_v44 }
 0x127   :  { %v322_v46 = vpack.c.bf16 %v321_v45, %v321_v45 }
 0x129   :  { %v323_v47 = vunpack.c.l.bf16 %v322_v46 }
 0x12b   :  { %v324_v48 = vsub.f32 %v321_v45, %v323_v47 }
 0x12d   :  { %v325_v49 = vpack.c.bf16 %v324_v48, %v324_v48 }
 0x12f   :  { %358 = vmatprep.mubr.bf16.mxu0 %v325_v49 }
 0x130   :  { %359 = vmatmul.mubr.bf16.vlgmr.msra.gmra.mrb[4].mxu0 %v322_v46 }
 0x203   :  { %v466_v50 = vpop.f32.mrb[4].mxu0 }
 0x204   :  { %v467_v51 = vpop.f32.mrb[5].mxu0 }
 0x205   :  { %v468_v52 = vadd.f32 %v467_v51, %v466_v50  ;;  %v469_v53 = vpop.f32.mrb[6].mxu0 }
 0x206   :  { %v470_v54 = vpop.f32.mrb[7].mxu0 }
 0x207   :  { %v366_v55 = vmul.f32 0.032258064, %v468_v52 }
 0x209   :  { %v367_v56 = vmax.f32 %v366_v55, 0.0 }
 0x20b   :  { %523 = vrsqrt.f32 %v367_v56  ;;  %vm370_vm1 = vcmp.eq.f32.partialorder %v367_v56, inf  ;;  %v373_v59 = vand.u32 2147483648, %v367_v56  ;;  %vm372_vm2 = vcmp.eq.f32.partialorder %v367_v56, 0.0 }
 0x215   :  { %v524_v57 = vpop.eup %523 }
 0x216   :  { %v369_v58 = vmul.f32 %v524_v57, %v367_v56 }
 0x218   :  { %v371_v60 = vsel %vm370_vm1, %v367_v56, %v369_v58 }
 0x219   :  { %v374_v61 = vsel %vm372_vm2, %v373_v59, %v371_v60 }
 0x21a   :  { %v375_v62 = vadd.f32 1e-06, %v374_v61 }
 0x21c   :  { %525 = vrcp.f32 %v375_v62 }
 0x226   :  { %v526_v63 = vpop.eup %525 }
 0x227   :  { %v377_v0 = vmul.f32 %v526_v63, %v320_v44 }
 0x229   :  { %378 = vst [vmem:[#allocation7] sm:$0xff] %v377_v0 }
 0x22a   :  { %582 = shalt.err (!%p579_p6)
}
 0x22b   :  { %s583_s10 = scalar_lea.hbm %s663_s2, 128 }
 0x22c   :  { %p584_p7 = scmp.ne.s32.totalorder %s663_s2, %s583_s10  ;;  %p587_p8 = scmp.lt.u32.totalorder %s583_s10, %s663_s2 }
 0x22e   :  { %p589_p9 = pnand %p587_p8, %p584_p7 }
 0x230   :  { %592 = shalt.err (!%p589_p9)
}
 0x231   :  { %388 = dma.vmem_to_hbm [thread:$0]  %s386_s6, 128, %s663_s2, [#allocation4]  }
 0x232   :  { %597 = dma.done.wait [#allocation4], 128  }
 0x233   :  { %598 = vsyncadd [#allocation4], 4294967168 }
 0x234   :  { %392 = vsyncpa [#allocation3], 1 }
 0x235   :  { %393 = vsyncpa [#allocation6], 1 }
 0x236   :  { %394 = vsyncpa [#allocation4], 1 }

</bundles_post_ra>
